<compile_context>
chip_gen: v6e
topology: v6e:2x2x1
jax: 0.10.0
libtpu: 0.0.40
codegen_flags: <defaults>
</compile_context>

<pallas_src>
import numpy as np

import jax
import jax.numpy as jnp
from jax import lax
from jax.experimental import pallas as pl
from jax.experimental.pallas import tpu as pltpu


def _fusion_kernel(x1_ref, x2_ref, w1_ref, w2_ref, shift_ref, o_ref):
    # x1/x2 : (b_blk, C_in, t_hw)   NCHW-native spatial tiles of each input feature
    # w1/w2 : (C_out, C_in)         1x1-conv weight halves with BN scale pre-folded
    # shift : (C_out, 1)            folded conv-bias + BN shift (f32)
    # o     : (b_blk, C_out, t_hw)  lane-dense output tile
    b = x1_ref.shape[0]
    c_out, c_in = w1_ref.shape
    # Broadcast the tiny weight tile over the batch block so the contraction is a
    # plain batched dot_general (no in-kernel transposes).
    w1 = jnp.broadcast_to(w1_ref[...].reshape(1, c_out, c_in), (b, c_out, c_in))
    w2 = jnp.broadcast_to(w2_ref[...].reshape(1, c_out, c_in), (b, c_out, c_in))
    dn = (((2,), (1,)), ((0,), (0,)))  # contract C_in, batch over b_blk
    acc = lax.dot_general(w1, x1_ref[...], dn, preferred_element_type=jnp.float32)
    acc = acc + lax.dot_general(w2, x2_ref[...], dn, preferred_element_type=jnp.float32)
    y = acc + shift_ref[...]           # (C_out, 1) broadcasts over (b, C_out, t_hw)
    o_ref[...] = jnp.maximum(y, 0.0).astype(o_ref.dtype)


def _select_tiles(N, C_in, C_out, HW, in_bytes, out_bytes):
    """Pick (b_blk, t_hw) so each grid step moves ~4 MiB of HBM traffic while the
    double-buffered VMEM footprint stays under ~12 MiB (safe on v5e/v6e/v7x)."""
    lane_bytes = 2 * C_in * in_bytes + C_out * out_bytes      # HBM bytes per (batch, lane)
    target_step_bytes = 4 << 20
    vmem_cap_bytes = 12 << 20
    max_lanes = max(128, vmem_cap_bytes // (2 * lane_bytes))  # (batch*lane) elems per step

    if HW <= max_lanes:
        # Small / moderate feature map: take the full spatial extent (legal for any HW,
        # no padding needed) and block several batch elements per step instead.
        t_hw = HW
        want_b = max(1, target_step_bytes // max(1, HW * lane_bytes))
        b_blk = int(min(N, want_b, 64, max(1, max_lanes // max(1, HW))))
    else:
        t_cap = min(max_lanes, max(128, target_step_bytes // lane_bytes))
        t_hw = max(128, (t_cap // 128) * 128)                 # multiple of 128
        b_blk = 1

    # Keep a few grid steps when the problem is big enough so the "parallel" grid axes
    # have something to shard across v7x's 2 TensorCores (free on v5e/v6e).
    total_bytes = N * HW * lane_bytes

    def n_steps(bb, tt):
        return -(-N // bb) * (-(-HW // tt))

    while total_bytes > (8 << 20) and n_steps(b_blk, t_hw) < 4:
        if b_blk > 1:
            b_blk = max(1, b_blk // 2)
        elif t_hw % 256 == 0 and t_hw > 128:
            t_hw //= 2
        else:
            break
    return b_blk, t_hw


def feature_fusion(feat1, feat2, params, *, activation_dtype=None, out_dtype=None,
                   t_hw=None, b_blk=None):
    """feat1, feat2: (N, C_in, H, W). Returns (N, C_out, H, W).

    activation_dtype: optional dtype (e.g. jnp.bfloat16) for the streamed activations /
        weights on v6e/v7x; accumulation + epilogue stay in f32, output cast on store.
    """
    w, bias, gamma, beta, run_mean, run_var, eps = (
        params["w"], params["b"], params["gamma"], params["beta"],
        params["running_mean"], params["running_var"], params["eps"],
    )
    N, C_in, H, W = feat1.shape
    C_out = w.shape[0]
    HW = H * W

    act_dtype = np.dtype(activation_dtype) if activation_dtype is not None else np.dtype(feat1.dtype)
    out_dt = np.dtype(out_dtype) if out_dtype is not None else np.dtype(feat1.dtype)

    # (N, C, H, W) -> (N, C, H*W): contiguous-dim merge, no HBM data movement.
    # (The optional cast is done here; in a real pipeline the producer would emit bf16.)
    x1 = feat1.reshape(N, C_in, HW).astype(act_dtype)
    x2 = feat2.reshape(N, C_in, HW).astype(act_dtype)

    # Fold BN(eval) into the conv:  relu(bn(x @ W + b)) == relu(x @ (W*s) + shift)
    w_mat = w.reshape(C_out, 2 * C_in).astype(jnp.float32)
    inv_std = lax.rsqrt(run_var.astype(jnp.float32) + jnp.float32(eps))
    scale = gamma.astype(jnp.float32) * inv_std                      # (C_out,)
    w_scaled = w_mat * scale[:, None]                                # (C_out, 2*C_in)
    w1 = w_scaled[:, :C_in].astype(act_dtype)                        # (C_out, C_in)
    w2 = w_scaled[:, C_in:].astype(act_dtype)                        # (C_out, C_in)
    shift = (beta.astype(jnp.float32)
             + (bias.astype(jnp.float32) - run_mean.astype(jnp.float32)) * scale
             ).reshape(C_out, 1)                                     # (C_out, 1) f32

    in_bytes, out_bytes = act_dtype.itemsize, out_dt.itemsize
    auto_b, auto_t = _select_tiles(N, C_in, C_out, HW, in_bytes, out_bytes)
    if t_hw is None:
        t_hw = auto_t
    if b_blk is None:
        b_blk = auto_b
    b_blk = int(min(max(1, b_blk), N))
    t_hw = int(t_hw)
    assert t_hw == HW or t_hw % 128 == 0, "t_hw must be a multiple of 128 or the full extent"

    # Ragged extents handled by Pallas partial-final-block clipping (edge writeback is
    # masked), so no wrapper-side padding or output slicing is needed.
    grid = (pl.cdiv(N, b_blk), pl.cdiv(HW, t_hw))

    step_bytes = b_blk * t_hw * (2 * C_in * in_bytes + C_out * out_bytes)
    vmem_limit = int(min(32 << 20, max(16 << 20, 2 * step_bytes + (2 << 20))))

    cost = pl.CostEstimate(
        flops=int(2 * N * HW * C_out * 2 * C_in),
        transcendentals=0,
        bytes_accessed=int(N * HW * (2 * C_in * in_bytes + C_out * out_bytes)
                           + 2 * C_out * C_in * in_bytes + 4 * C_out),
    )

    out = pl.pallas_call(
        _fusion_kernel,
        out_shape=jax.ShapeDtypeStruct((N, C_out, HW), out_dt),
        grid_spec=pltpu.PrefetchScalarGridSpec(
            num_scalar_prefetch=0,
            grid=grid,
            in_specs=[
                pl.BlockSpec((b_blk, C_in, t_hw), lambda n, s: (n, 0, s)),
                pl.BlockSpec((b_blk, C_in, t_hw), lambda n, s: (n, 0, s)),
                # weights / shift: constant block index -> stay resident in VMEM
                pl.BlockSpec((C_out, C_in), lambda n, s: (0, 0)),
                pl.BlockSpec((C_out, C_in), lambda n, s: (0, 0)),
                pl.BlockSpec((C_out, 1), lambda n, s: (0, 0)),
            ],
            out_specs=pl.BlockSpec((b_blk, C_out, t_hw), lambda n, s: (n, 0, s)),
        ),
        compiler_params=pltpu.CompilerParams(
            dimension_semantics=("parallel", "parallel"),
            vmem_limit_bytes=vmem_limit),
        cost_estimate=cost,
    )(x1, x2, w1, w2, shift)

    return out.reshape(N, C_out, H, W)


def init_params(key, in_channels, out_channels):
    k1, k2, k3, k4, k5, k6 = jax.random.split(key, 6)
    c2 = in_channels * 2
    return {
        "w": jax.random.normal(k1, (out_channels, c2, 1, 1), jnp.float32) * 0.1,
        "b": jax.random.normal(k2, (out_channels,), jnp.float32) * 0.1,
        "gamma": 1.0 + 0.1 * jax.random.normal(k3, (out_channels,), jnp.float32),
        "beta": 0.1 * jax.random.normal(k4, (out_channels,), jnp.float32),
        "running_mean": 0.1 * jax.random.normal(k5, (out_channels,), jnp.float32),
        "running_var": jnp.abs(1.0 + 0.1 * jax.random.normal(k6, (out_channels,), jnp.float32)),
        "eps": 1e-5,
    }


def _reference(feat1, feat2, params):
    """Pure-JAX reference: concat -> 1x1 conv -> BN(eval) -> ReLU."""
    C_out = params["w"].shape[0]
    fused = jnp.concatenate([feat1, feat2], axis=1)
    w_mat = params["w"].reshape(C_out, fused.shape[1])
    conv = jnp.einsum("nchw,oc->nohw", fused, w_mat) + params["b"][None, :, None, None]
    inv_std = 1.0 / jnp.sqrt(params["running_var"] + params["eps"])
    ref = (conv - params["running_mean"][None, :, None, None]) \
        * (params["gamma"] * inv_std)[None, :, None, None] \
        + params["beta"][None, :, None, None]
    return jnp.maximum(ref, 0.0)


if __name__ == "__main__":
    key = jax.random.PRNGKey(0)
    kf1, kf2, kp = jax.random.split(key, 3)

    # Base test (in_channels=4, out_channels=8, as the module implies).
    N, C_in, H, W, C_out = 2, 4, 16, 16, 8
    feat1 = jax.random.normal(kf1, (N, C_in, H, W), jnp.float32)
    feat2 = jax.random.normal(kf2, (N, C_in, H, W), jnp.float32)
    params = init_params(kp, C_in, C_out)

    out = feature_fusion(feat1, feat2, params)
    jax.block_until_ready(out)
    ref = _reference(feat1, feat2, params)
    assert out.shape == (N, C_out, H, W)
    assert jnp.allclose(out, ref, atol=1e-4, rtol=1e-4), "f32 mismatch vs reference"

    # Ragged-tile test: partial final blocks on both grid axes (no wrapper pad/slice;
    # Pallas masks the edge-block writeback).
    N2, H2, W2 = 3, 20, 20
    kg1, kg2 = jax.random.split(kf1)
    g1 = jax.random.normal(kg1, (N2, C_in, H2, W2), jnp.float32)
    g2 = jax.random.normal(kg2, (N2, C_in, H2, W2), jnp.float32)
    out2 = feature_fusion(g1, g2, params, t_hw=128, b_blk=2)
    jax.block_until_ready(out2)
    ref2 = _reference(g1, g2, params)
    assert out2.shape == (N2, C_out, H2, W2)
    assert jnp.allclose(out2, ref2, atol=1e-4, rtol=1e-4), "ragged-tile mismatch"

    # bf16 activation path (halves HBM read traffic on v6e/v7x); f32 accumulate/epilogue.
    out3 = feature_fusion(feat1, feat2, params, activation_dtype=jnp.bfloat16)
    jax.block_until_ready(out3)
    assert jnp.allclose(out3, ref, atol=5e-2, rtol=5e-2), "bf16 path mismatch"

    print("KERNEL_OK")
</pallas_src>

<mosaic_0001>
module attributes {stable_mosaic.version = 11 : i64} {
  func.func @_fusion_kernel(%arg0: i32, %arg1: i32, %arg2: memref<2x4x256xf32, #tpu.memory_space<vmem>>, %arg3: memref<2x4x256xf32, #tpu.memory_space<vmem>>, %arg4: memref<8x4xf32, #tpu.memory_space<vmem>>, %arg5: memref<8x4xf32, #tpu.memory_space<vmem>>, %arg6: memref<8x1xf32, #tpu.memory_space<vmem>>, %arg7: memref<2x8x256xf32, #tpu.memory_space<vmem>>) attributes {dimension_semantics = [#tpu.dimension_semantics<parallel>, #tpu.dimension_semantics<parallel>], iteration_bounds = array<i64: 1, 1>, scalar_prefetch = 0 : i64, scratch_operands = 0 : i64, tpu.core_type = #tpu.core_type<tc>, window_params = [{transform_indices = @transform_0, window_bounds = array<i64: 2, 4, 256>}, {transform_indices = @transform_1, window_bounds = array<i64: 2, 4, 256>}, {pipeline_mode = #tpu.pipeline_mode<synchronous>, transform_indices = @transform_2, window_bounds = array<i64: 8, 4>}, {pipeline_mode = #tpu.pipeline_mode<synchronous>, transform_indices = @transform_3, window_bounds = array<i64: 8, 4>}, {pipeline_mode = #tpu.pipeline_mode<synchronous>, transform_indices = @transform_4, window_bounds = array<i64: 8, 1>}, {transform_indices = @transform_5, window_bounds = array<i64: 2, 8, 256>}]} {
    %c0 = arith.constant 0 : index
    %c0_0 = arith.constant 0 : index
    %0 = vector.load %arg4[%c0, %c0_0] : memref<8x4xf32, #tpu.memory_space<vmem>>, vector<8x4xf32>
    %1 = vector.shape_cast %0 : vector<8x4xf32> to vector<1x8x4xf32>
    %2 = vector.shape_cast %1 : vector<1x8x4xf32> to vector<1x8x4xf32>
    %3 = vector.broadcast %2 : vector<1x8x4xf32> to vector<2x8x4xf32>
    %c0_1 = arith.constant 0 : index
    %c0_2 = arith.constant 0 : index
    %4 = vector.load %arg5[%c0_1, %c0_2] : memref<8x4xf32, #tpu.memory_space<vmem>>, vector<8x4xf32>
    %5 = vector.shape_cast %4 : vector<8x4xf32> to vector<1x8x4xf32>
    %6 = vector.shape_cast %5 : vector<1x8x4xf32> to vector<1x8x4xf32>
    %7 = vector.broadcast %6 : vector<1x8x4xf32> to vector<2x8x4xf32>
    %c0_3 = arith.constant 0 : index
    %c0_4 = arith.constant 0 : index
    %c0_5 = arith.constant 0 : index
    %8 = vector.load %arg2[%c0_3, %c0_4, %c0_5] : memref<2x4x256xf32, #tpu.memory_space<vmem>>, vector<2x4x256xf32>
    %cst = arith.constant dense<0.000000e+00> : vector<2x8x256xf32>
    %9 = tpu.matmul %3, %8, %cst {dimension_numbers = #tpu.dot_dimension_numbers<[2], [1], [1], [2], [0, 0, 0, 1, 1, 2], [0], [0]>} : vector<2x8x4xf32>, vector<2x4x256xf32>, vector<2x8x256xf32> -> vector<2x8x256xf32>
    %c0_6 = arith.constant 0 : index
    %c0_7 = arith.constant 0 : index
    %c0_8 = arith.constant 0 : index
    %10 = vector.load %arg3[%c0_6, %c0_7, %c0_8] : memref<2x4x256xf32, #tpu.memory_space<vmem>>, vector<2x4x256xf32>
    %cst_9 = arith.constant dense<0.000000e+00> : vector<2x8x256xf32>
    %11 = tpu.matmul %7, %10, %cst_9 {dimension_numbers = #tpu.dot_dimension_numbers<[2], [1], [1], [2], [0, 0, 0, 1, 1, 2], [0], [0]>} : vector<2x8x4xf32>, vector<2x4x256xf32>, vector<2x8x256xf32> -> vector<2x8x256xf32>
    %12 = arith.addf %9, %11 : vector<2x8x256xf32>
    %c0_10 = arith.constant 0 : index
    %c0_11 = arith.constant 0 : index
    %13 = vector.load %arg6[%c0_10, %c0_11] : memref<8x1xf32, #tpu.memory_space<vmem>>, vector<8x1xf32>
    %14 = vector.shape_cast %13 : vector<8x1xf32> to vector<1x8x1xf32>
    %15 = vector.broadcast %14 : vector<1x8x1xf32> to vector<2x8x256xf32>
    %16 = arith.addf %12, %15 : vector<2x8x256xf32>
    %cst_12 = arith.constant 0.000000e+00 : f32
    %17 = vector.broadcast %cst_12 : f32 to vector<2x8x256xf32>
    %18 = arith.maximumf %16, %17 : vector<2x8x256xf32>
    %c0_13 = arith.constant 0 : index
    %c0_14 = arith.constant 0 : index
    %c0_15 = arith.constant 0 : index
    %19 = vector.load %arg7[%c0_13, %c0_14, %c0_15] : memref<2x8x256xf32, #tpu.memory_space<vmem>>, vector<2x8x256xf32>
    tpu.vector_store %arg7[%c0_13, %c0_14, %c0_15], %18 {strides = array<i32>} : memref<2x8x256xf32, #tpu.memory_space<vmem>>, vector<2x8x256xf32>,
    return
  }
  func.func @transform_0(%arg0: i32, %arg1: i32) -> (i32, i32, i32) {
    %c0_i32 = arith.constant 0 : i32
    %c0_i32_0 = arith.constant 0 : i32
    return %arg0, %c0_i32, %arg1 : i32, i32, i32
  }
  func.func @transform_1(%arg0: i32, %arg1: i32) -> (i32, i32, i32) {
    %c0_i32 = arith.constant 0 : i32
    %c0_i32_0 = arith.constant 0 : i32
    return %arg0, %c0_i32, %arg1 : i32, i32, i32
  }
  func.func @transform_2(%arg0: i32, %arg1: i32) -> (i32, i32) {
    %c0_i32 = arith.constant 0 : i32
    %c0_i32_0 = arith.constant 0 : i32
    %c0_i32_1 = arith.constant 0 : i32
    return %c0_i32, %c0_i32_0 : i32, i32
  }
  func.func @transform_3(%arg0: i32, %arg1: i32) -> (i32, i32) {
    %c0_i32 = arith.constant 0 : i32
    %c0_i32_0 = arith.constant 0 : i32
    %c0_i32_1 = arith.constant 0 : i32
    return %c0_i32, %c0_i32_0 : i32, i32
  }
  func.func @transform_4(%arg0: i32, %arg1: i32) -> (i32, i32) {
    %c0_i32 = arith.constant 0 : i32
    %c0_i32_0 = arith.constant 0 : i32
    %c0_i32_1 = arith.constant 0 : i32
    return %c0_i32, %c0_i32_0 : i32, i32
  }
  func.func @transform_5(%arg0: i32, %arg1: i32) -> (i32, i32, i32) {
    %c0_i32 = arith.constant 0 : i32
    %c0_i32_0 = arith.constant 0 : i32
    return %arg0, %c0_i32, %arg1 : i32, i32, i32
  }
}

</mosaic_0001>

<bundles_post_ra>
// kernel: tpu_custom_call.1
= control target key start
LH: loop header
LB: loop body
LE: loop exit
PB: predicated region body
PF: predicated region fallthrough
CT: control target
= control target key end

     0   :  { %vm33_vm0 = vcmask 1043456   ;;  %v421_v4 = vmov 0.0   ;;  %vm29_vm1 = vcmask 31744   ;;  %v422_v10 = vmov 0   ;;  %s492_s0 = inlined_call_operand.vmem [shape: f32[2,4,256], index: 0, kind: input, shape index: {}]   ;;  %s493_s1 = inlined_call_operand.vmem [shape: f32[2,4,256], index: 1, kind: input, shape index: {}]   ;;  %s494_s2 = inlined_call_operand.vmem [shape: f32[8,4], index: 2, kind: input, shape index: {}]   ;;  %s495_s3 = inlined_call_operand.vmem [shape: f32[8,4], index: 3, kind: input, shape index: {}]   ;;  %s496_s4 = inlined_call_operand.vmem [shape: f32[8,1], index: 4, kind: input, shape index: {}]   ;;  %s497_s5 = inlined_call_operand.hbm [shape: f32[2,8,256], index: 5, kind: output, shape index: {}]  }
   0x1   :  { %v25_v0 = vld [vmem:[%s493_s1] sm:$0xff]  ;;  %v26_v1 = vld [vmem:[%s493_s1 + $0x8] sm:$0xff]  ;;  %102 = vmatprep.mubr.f32.mxu0 %v421_v4  ;;  %179 = vmatprep.mubr.f32.mxu1 %v421_v4 }
   0x2   :  { %v28_v2 = vcombine.high %v25_v0, %v25_v0  ;;  %v110_v3 = vcombine.high %v26_v1, %v26_v1  ;;  %v23_v5 = vld [vmem:[%s492_s0] sm:$0xff]  ;;  %v24_v6 = vld [vmem:[%s492_s0 + $0x8] sm:$0xff]  ;;  %394 = vset.pattern.permute.xlu0 %v422_v10 }
   0x3   :  { %v22_v7 = vld [vmem:[%s495_s3] sm:$0xff]  ;;  %v187_v8 = vcombine.high %v23_v5, %v23_v5  ;;  %v267_v9 = vcombine.high %v24_v6, %v24_v6 }
   0x4   :  { %10 = vsyncpa [#allocation3], 0  ;;  %377 = vmatprep.subr.msk.mxu0 %vm33_vm0, %v28_v2  ;;  %380 = vmatprep.subr.msk.mxu1 %vm33_vm0, %v110_v3  ;;  %v21_v11 = vld [vmem:[%s494_s2] sm:$0xff]  ;;  %s423_s2 = smov [#allocation2]  }
   0x5   :  { %378 = vmatpush1.msk.msra.mxu0 %vm33_vm0, %v25_v0  ;;  %381 = vmatpush1.msk.msra.mxu1 %vm33_vm0, %v26_v1  ;;  %v343_v12 = vld [vmem:[%s496_s4] sm:$0xff]  ;;  %s366_s4 = sshll.u32 %s423_s2, 4  ;;  %s367_s4 = int_to_ptr.vmem [resolvable:$true] %s366_s4 }
   0x6   :  { %379 = vmatmul.mubr.msk.f32.vlgmr.msra.gmra.mxu0 %vm29_vm1, %v22_v7  ;;  %382 = vmatmul.mubr.msk.f32.vlgmr.msra.gmra.mxu1 %vm29_vm1, %v22_v7  ;;  %s399_s29 = scalar_lea.vmem %s367_s4, 512  ;;  %p404_p1 = scmp.lt.s32.totalorder %s367_s4, %s367_s4 }
   0x7   :  { %383 = vmatprep.subr.msk.mxu0 %vm33_vm0, %v187_v8  ;;  %386 = vmatprep.subr.msk.mxu1 %vm33_vm0, %v267_v9  ;;  %p400_p0 = scmp.ne.s32.totalorder %s367_s4, %s399_s29  ;;  %p405_p2 = scmp.lt.s32.totalorder %s399_s29, %s399_s29 }
   0x8   :  { %384 = vmatpush1.msk.msra.mxu0 %vm33_vm0, %v23_v5  ;;  %387 = vmatpush1.msk.msra.mxu1 %vm33_vm0, %v24_v6 }
   0x9   :  { %259 = vmatprep.mubr.f32.mxu0 %v421_v4  ;;  %336 = vmatprep.mubr.f32.mxu1 %v421_v4  ;;  %p406_p3 = por %p405_p2, %p404_p1 }
   0xa   :  { %385 = vmatmul.mubr.msk.f32.vlgmr.msra.gmra.mxu0 %vm29_vm1, %v21_v11  ;;  %388 = vmatmul.mubr.msk.f32.vlgmr.msra.gmra.mxu1 %vm29_vm1, %v21_v11 }
   0xb   :  { %346 = vperm.xlu0 %394, %v343_v12   ;;  %p407_p4 = pnand %p406_p3, %p400_p0 }
  0x86   :  { %v347_v17 = vpop.permute.xlu0 %346 }
  0xc6   :  { %v104_v13 = vpop.f32.mrf.mxu0  ;;  %v181_v14 = vpop.f32.mrf.mxu1 }
  0xc8   :  { %v106_v15 = vpop.f32.mrf.mxu0  ;;  %v183_v16 = vpop.f32.mrf.mxu1 }
  0xca   :  { %v261_v18 = vpop.f32.mrf.mxu0  ;;  %v338_v19 = vpop.f32.mrf.mxu1 }
  0xcb   :  { %v262_v20 = vadd.f32 %v261_v18, %v104_v13  ;;  %v339_v21 = vadd.f32 %v338_v19, %v181_v14 }
  0xcc   :  { %v263_v22 = vpop.f32.mrf.mxu0  ;;  %v340_v23 = vpop.f32.mrf.mxu1 }
  0xcd   :  { %v349_v24 = vadd.f32 %v347_v17, %v262_v20  ;;  %v351_v25 = vadd.f32 %v347_v17, %v339_v21  ;;  %v264_v26 = vadd.f32 %v263_v22, %v106_v15  ;;  %v341_v27 = vadd.f32 %v340_v23, %v183_v16 }
  0xcf   :  { %v353_v28 = vmax.f32 %v349_v24, 0.0  ;;  %v355_v29 = vmax.f32 %v351_v25, 0.0  ;;  %v350_v30 = vadd.f32 %v347_v17, %v264_v26  ;;  %v352_v31 = vadd.f32 %v347_v17, %v341_v27 }
  0xd1   :  { %357 = vst [vmem:[#allocation2] sm:$0xff] %v353_v28  ;;  %359 = vst [vmem:[#allocation2 + $0x10] sm:$0xff] %v355_v29  ;;  %v354_v32 = vmax.f32 %v350_v30, 0.0  ;;  %v356_v33 = vmax.f32 %v352_v31, 0.0 }
  0xd3   :  { %358 = vst [vmem:[#allocation2 + $0x8] sm:$0xff] %v354_v32  ;;  %360 = vst [vmem:[#allocation2 + $0x18] sm:$0xff] %v356_v33 }
  0xd4   :  { %410 = shalt.err (!%p407_p4)
}
  0xd5   :  { %s424_s30 = smov 256   ;;  %s425_s6 = smov 16  }
  0xd6   :  { %372 = dma.vmem_to_hbm [thread:$0]  %s367_s4, 512, %s497_s5, [#allocation3], %s424_s30, %s424_s30, %s425_s6  }
  0xd7   :  { %419 = dma.done.wait [#allocation3], 512  }
  0xd8   :  { %420 = vsyncadd [#allocation3], 4294966784 }
  0xd9   :  { %376 = vsyncpa [#allocation3], 1 }

</bundles_post_ra>
